<compile_context>
chip_gen: v7x
topology: tpu7x:2x2x1
jax: 0.10.0
libtpu: 0.0.40
codegen_flags: <defaults>
</compile_context>

<pallas_src>
import functools

import jax
import jax.numpy as jnp
from jax import lax
from jax.experimental import pallas as pl
from jax.experimental.pallas import tpu as pltpu

_LANE = 128


def _masked_bn_kernel(inv_n_ref, x_ref, mask_ref, w_ref, b_ref, o_ref, *,
                      eps, pad_count):
    """One grid step = one (B, Ct, Lp) channel tile; fully self-contained."""
    x = x_ref[...].astype(jnp.float32)         # (B, Ct, Lp)
    m = mask_ref[...].astype(jnp.float32)      # (B, 1, Lp)
    inv_n = inv_n_ref[...]                     # (1, 1, 1): 1 / mask.sum()

    masked = x * m                             # broadcast mask over channels

    # Exact two-pass per-channel statistics within the VMEM-resident tile.
    # Reference semantics: sum((masked - mean)^2) over ALL B*L positions
    # (masked-out slots included), divided by n = mask.sum().  Each L-padded
    # position (mask == 0, masked == 0) contributes an extra mean^2, removed
    # with the static pad_count term below.
    mean = jnp.sum(masked, axis=(0, 2), keepdims=True) * inv_n     # (1, Ct, 1)
    diff = masked - mean
    var = (jnp.sum(diff * diff, axis=(0, 2), keepdims=True)
           - pad_count * mean * mean) * inv_n
    var = jnp.maximum(var, 0.0)                # guard against f32 round-off

    inv_std = lax.rsqrt(var + eps)             # EUP; tiny (1, Ct, 1)
    w = w_ref[...].astype(jnp.float32)         # (1, Ct, 1)
    b = b_ref[...].astype(jnp.float32)         # (1, Ct, 1)
    scale = w * inv_std                        # fold:  out = masked*scale + shift
    shift = b - mean * scale

    o_ref[...] = (masked * scale + shift).astype(o_ref.dtype)


def _vmem_params():
    """Generation-aware VMEM limit and a flag requesting >= 2 channel tiles.

    v5e/v6e (128 MiB physical): limit = 64 MiB.  v7x (64 MiB physical per TC):
    limit ~= 41 MiB and >= 2 channel tiles so both TensorCores get work.
    """
    default_cap = 64 << 20                     # conservative (v7x per-TC)
    try:
        info = pltpu.get_tpu_info()
        vmem_cap = int(getattr(info, "vmem_capacity_bytes", default_cap))
    except Exception:
        vmem_cap = default_cap
    vmem_limit = min(int(vmem_cap * 0.65), 64 << 20)
    want_multi_tile = vmem_cap <= (64 << 20)   # v7x-class heuristic (2 TCs)
    return vmem_limit, want_multi_tile


def _pick_channel_tile(B, C, Lp, x_itemsize, mask_itemsize, vmem_limit,
                       want_multi_tile, max_channel_tile):
    """Largest channel tile Ct that divides C, respects the (8, 128) sublane
    rule (multiple of 8, or the full C), and whose pipelined VMEM residency
    (2x double-buffered input + 2x output tiles in the input dtype plus two
    full-tile f32 temporaries) fits the VMEM limit."""
    candidates = sorted({C} | {d for d in range(8, C, 8) if C % d == 0})
    if want_multi_tile:
        split = [ct for ct in candidates if ct <= C // 2]
        if split:                              # only cap if C can be split at all
            candidates = split
    if max_channel_tile is not None:
        capped = [ct for ct in candidates if ct <= max_channel_tile]
        if capped:
            candidates = capped

    per_elem = 4 * x_itemsize + 2 * 4          # 2x in + 2x out + 2x f32 temps
    fixed = 2 * B * Lp * mask_itemsize + 4 * C * 4 + (1 << 20)  # mask/w/b/slack
    budget = vmem_limit - fixed

    best = None
    for ct in candidates:                      # ascending
        if B * ct * Lp * per_elem <= budget:
            best = ct
    if best is None:
        raise ValueError(
            "masked_batch_norm_1d: smallest channel tile "
            f"(B={B}, Ct={candidates[0]}, Lp={Lp}) exceeds the VMEM budget "
            f"({budget} bytes). Reduce B*L or implement the accumulator "
            "fallback (see TODO).")
    return best


def masked_batch_norm_1d(x, mask, weight, bias, eps=1e-5, *,
                         max_channel_tile=None):
    """Forward of MaskedBatchNorm1d (training / batch-statistics path).

    x: (B, C, L); mask: (B, 1, L) of 0/1; weight/bias: (C, 1) or (C,).
    """
    B, C, L = x.shape
    assert mask.shape == (B, 1, L), "Mask should have shape (B, 1, L)."
    w = jnp.asarray(weight).reshape(1, C, 1).astype(jnp.float32)
    b = jnp.asarray(bias).reshape(1, C, 1).astype(jnp.float32)

    # Hoist n and 1/n out of the kernel: computed once here, fed through a
    # tiny constant-index (1, 1, 1) block (no per-tile mask reduction/divide).
    n = jnp.sum(mask.astype(jnp.float32))
    inv_n = (1.0 / n).reshape(1, 1, 1).astype(jnp.float32)

    # Lane-dense padding: L up to a multiple of 128 for unmasked stores.
    Lp = ((L + _LANE - 1) // _LANE) * _LANE
    if Lp != L:
        x_p = jnp.pad(x, ((0, 0), (0, 0), (0, Lp - L)))
        mask_p = jnp.pad(mask, ((0, 0), (0, 0), (0, Lp - L)))
    else:
        x_p, mask_p = x, mask

    x_itemsize = jnp.dtype(x.dtype).itemsize
    mask_itemsize = jnp.dtype(mask.dtype).itemsize
    vmem_limit, want_multi_tile = _vmem_params()
    Ct = _pick_channel_tile(B, C, Lp, x_itemsize, mask_itemsize, vmem_limit,
                            want_multi_tile, max_channel_tile)
    num_tiles = C // Ct

    kernel = functools.partial(_masked_bn_kernel, eps=float(eps),
                               pad_count=float(B * (Lp - L)))

    cost = pl.CostEstimate(
        flops=int(8 * B * C * Lp),
        transcendentals=int(C),
        bytes_accessed=int(2 * B * C * Lp * x_itemsize        # x + out
                           + B * Lp * mask_itemsize           # mask (once)
                           + 2 * C * 4),                      # weight + bias
    )

    out_p = pl.pallas_call(
        kernel,
        out_shape=jax.ShapeDtypeStruct((B, C, Lp), x.dtype),
        grid_spec=pltpu.PrefetchScalarGridSpec(
            num_scalar_prefetch=0,
            grid=(num_tiles,),
            in_specs=[
                pl.BlockSpec((1, 1, 1), lambda c: (0, 0, 0)),     # inv_n
                pl.BlockSpec((B, Ct, Lp), lambda c: (0, c, 0)),   # x tile
                pl.BlockSpec((B, 1, Lp), lambda c: (0, 0, 0)),    # mask (resident)
                pl.BlockSpec((1, Ct, 1), lambda c: (0, c, 0)),    # weight tile
                pl.BlockSpec((1, Ct, 1), lambda c: (0, c, 0)),    # bias tile
            ],
            out_specs=pl.BlockSpec((B, Ct, Lp), lambda c: (0, c, 0)),
        ),
        compiler_params=pltpu.CompilerParams(
            dimension_semantics=("parallel",),     # channel tiles independent
            vmem_limit_bytes=int(vmem_limit),
        ),
        cost_estimate=cost,
    )(inv_n, x_p, mask_p, w, b)

    return out_p[:, :, :L] if Lp != L else out_p


def masked_batch_norm_1d_ref(x, mask, weight, bias, eps=1e-5):
    """Pure-JAX reference matching the PyTorch forward (training / batch stats)."""
    masked = x * mask
    n = jnp.sum(mask)
    mean = jnp.sum(masked, axis=(0, 2), keepdims=True) / n
    var = jnp.sum((masked - mean) ** 2, axis=(0, 2), keepdims=True) / n
    normed = (masked - mean) / jnp.sqrt(var + eps)
    return normed * jnp.asarray(weight).reshape(1, -1, 1) + \
        jnp.asarray(bias).reshape(1, -1, 1)


if __name__ == "__main__":
    key = jax.random.PRNGKey(0)

    # --- Small, module-scale smoke test (default params: weight=1, bias=0).
    #     L=16 exercises the lane-padding (16 -> 128) + variance correction. ---
    B, C, L = 2, 4, 16
    k1, k2, krest = jax.random.split(key, 3)
    x = jax.random.normal(k1, (B, C, L), dtype=jnp.float32)
    mask = (jax.random.uniform(k2, (B, 1, L)) < 0.7).astype(jnp.float32)
    mask = mask.at[:, :, 0].set(1.0)            # at least one valid slot / batch
    weight = jnp.ones((C, 1), dtype=jnp.float32)
    bias = jnp.zeros((C, 1), dtype=jnp.float32)

    out = jax.block_until_ready(masked_batch_norm_1d(x, mask, weight, bias))
    ref = masked_batch_norm_1d_ref(x, mask, weight, bias)
    assert out.shape == (B, C, L)
    assert jnp.allclose(out, ref, atol=1e-4, rtol=1e-4), (
        f"max abs err = {jnp.max(jnp.abs(out - ref))}"
    )

    # --- Tiling + padding exercising shape: C % 8 == 0, L % 128 != 0, with a
    #     forced small channel tile so the grid has multiple steps. -----------
    B2, C2, L2 = 2, 16, 200
    k3, k4, k5, k6 = jax.random.split(krest, 4)
    x2 = jax.random.normal(k3, (B2, C2, L2), dtype=jnp.float32)
    mask2 = (jax.random.uniform(k4, (B2, 1, L2)) < 0.6).astype(jnp.float32)
    mask2 = mask2.at[:, :, 0].set(1.0)
    w2 = jax.random.normal(k5, (C2, 1), dtype=jnp.float32)
    b2 = jax.random.normal(k6, (C2, 1), dtype=jnp.float32)

    out2 = jax.block_until_ready(
        masked_batch_norm_1d(x2, mask2, w2, b2, max_channel_tile=8))  # 2 tiles
    ref2 = masked_batch_norm_1d_ref(x2, mask2, w2, b2)
    assert out2.shape == (B2, C2, L2)
    assert jnp.allclose(out2, ref2, atol=1e-4, rtol=1e-4), (
        f"max abs err = {jnp.max(jnp.abs(out2 - ref2))}"
    )

    print("KERNEL_OK")
</pallas_src>

<mosaic_0001>
module attributes {stable_mosaic.version = 11 : i64} {
  func.func @_masked_bn_kernel(%arg0: i32, %arg1: memref<1x1x1xf32, #tpu.memory_space<vmem>>, %arg2: memref<2x4x128xf32, #tpu.memory_space<vmem>>, %arg3: memref<2x1x128xf32, #tpu.memory_space<vmem>>, %arg4: memref<1x4x1xf32, #tpu.memory_space<vmem>>, %arg5: memref<1x4x1xf32, #tpu.memory_space<vmem>>, %arg6: memref<2x4x128xf32, #tpu.memory_space<vmem>>) attributes {dimension_semantics = [#tpu.dimension_semantics<parallel>], iteration_bounds = array<i64: 1>, scalar_prefetch = 0 : i64, scratch_operands = 0 : i64, tpu.core_type = #tpu.core_type<tc>, window_params = [{pipeline_mode = #tpu.pipeline_mode<synchronous>, transform_indices = @transform_0, window_bounds = array<i64: 1, 1, 1>}, {transform_indices = @transform_1, window_bounds = array<i64: 2, 4, 128>}, {pipeline_mode = #tpu.pipeline_mode<synchronous>, transform_indices = @transform_2, window_bounds = array<i64: 2, 1, 128>}, {transform_indices = @transform_3, window_bounds = array<i64: 1, 4, 1>}, {transform_indices = @transform_4, window_bounds = array<i64: 1, 4, 1>}, {transform_indices = @transform_5, window_bounds = array<i64: 2, 4, 128>}]} {
    %c0 = arith.constant 0 : index
    %c0_0 = arith.constant 0 : index
    %c0_1 = arith.constant 0 : index
    %0 = vector.load %arg2[%c0, %c0_0, %c0_1] : memref<2x4x128xf32, #tpu.memory_space<vmem>>, vector<2x4x128xf32>
    %c0_2 = arith.constant 0 : index
    %c0_3 = arith.constant 0 : index
    %c0_4 = arith.constant 0 : index
    %1 = vector.load %arg3[%c0_2, %c0_3, %c0_4] : memref<2x1x128xf32, #tpu.memory_space<vmem>>, vector<2x1x128xf32>
    %c0_5 = arith.constant 0 : index
    %c0_6 = arith.constant 0 : index
    %c0_7 = arith.constant 0 : index
    %2 = vector.load %arg1[%c0_5, %c0_6, %c0_7] : memref<1x1x1xf32, #tpu.memory_space<vmem>>, vector<1x1x1xf32>
    %3 = vector.broadcast %1 : vector<2x1x128xf32> to vector<2x4x128xf32>
    %4 = arith.mulf %0, %3 : vector<2x4x128xf32>
    %cst = arith.constant dense<0.000000e+00> : vector<4xf32>
    %5 = vector.multi_reduction <add>, %4, %cst [0, 2] : vector<2x4x128xf32> to vector<4xf32>
    %6 = vector.shape_cast %5 : vector<4xf32> to vector<1x4x1xf32>
    %7 = vector.broadcast %2 : vector<1x1x1xf32> to vector<1x4x1xf32>
    %8 = arith.mulf %6, %7 : vector<1x4x1xf32>
    %9 = vector.broadcast %8 : vector<1x4x1xf32> to vector<2x4x128xf32>
    %10 = arith.subf %4, %9 : vector<2x4x128xf32>
    %11 = arith.mulf %10, %10 : vector<2x4x128xf32>
    %cst_8 = arith.constant dense<0.000000e+00> : vector<4xf32>
    %12 = vector.multi_reduction <add>, %11, %cst_8 [0, 2] : vector<2x4x128xf32> to vector<4xf32>
    %13 = vector.shape_cast %12 : vector<4xf32> to vector<1x4x1xf32>
    %cst_9 = arith.constant 2.240000e+02 : f32
    %14 = vector.broadcast %cst_9 : f32 to vector<1x4x1xf32>
    %15 = arith.mulf %14, %8 : vector<1x4x1xf32>
    %16 = arith.mulf %15, %8 : vector<1x4x1xf32>
    %17 = arith.subf %13, %16 : vector<1x4x1xf32>
    %18 = vector.broadcast %2 : vector<1x1x1xf32> to vector<1x4x1xf32>
    %19 = arith.mulf %17, %18 : vector<1x4x1xf32>
    %cst_10 = arith.constant 0.000000e+00 : f32
    %20 = vector.broadcast %cst_10 : f32 to vector<1x4x1xf32>
    %21 = arith.maximumf %19, %20 : vector<1x4x1xf32>
    %cst_11 = arith.constant 9.99999974E-6 : f32
    %22 = vector.broadcast %cst_11 : f32 to vector<1x4x1xf32>
    %23 = arith.addf %21, %22 : vector<1x4x1xf32>
    %24 = math.rsqrt %23 : vector<1x4x1xf32>
    %c0_12 = arith.constant 0 : index
    %c0_13 = arith.constant 0 : index
    %c0_14 = arith.constant 0 : index
    %25 = vector.load %arg4[%c0_12, %c0_13, %c0_14] : memref<1x4x1xf32, #tpu.memory_space<vmem>>, vector<1x4x1xf32>
    %c0_15 = arith.constant 0 : index
    %c0_16 = arith.constant 0 : index
    %c0_17 = arith.constant 0 : index
    %26 = vector.load %arg5[%c0_15, %c0_16, %c0_17] : memref<1x4x1xf32, #tpu.memory_space<vmem>>, vector<1x4x1xf32>
    %27 = arith.mulf %25, %24 : vector<1x4x1xf32>
    %28 = arith.mulf %8, %27 : vector<1x4x1xf32>
    %29 = arith.subf %26, %28 : vector<1x4x1xf32>
    %30 = vector.broadcast %27 : vector<1x4x1xf32> to vector<2x4x128xf32>
    %31 = arith.mulf %4, %30 : vector<2x4x128xf32>
    %32 = vector.broadcast %29 : vector<1x4x1xf32> to vector<2x4x128xf32>
    %33 = arith.addf %31, %32 : vector<2x4x128xf32>
    %c0_18 = arith.constant 0 : index
    %c0_19 = arith.constant 0 : index
    %c0_20 = arith.constant 0 : index
    %34 = vector.load %arg6[%c0_18, %c0_19, %c0_20] : memref<2x4x128xf32, #tpu.memory_space<vmem>>, vector<2x4x128xf32>
    tpu.vector_store %arg6[%c0_18, %c0_19, %c0_20], %33 {strides = array<i32>} : memref<2x4x128xf32, #tpu.memory_space<vmem>>, vector<2x4x128xf32>,
    return
  }
  func.func @transform_0(%arg0: i32) -> (i32, i32, i32) {
    %c0_i32 = arith.constant 0 : i32
    %c0_i32_0 = arith.constant 0 : i32
    %c0_i32_1 = arith.constant 0 : i32
    %c0_i32_2 = arith.constant 0 : i32
    return %c0_i32, %c0_i32_0, %c0_i32_1 : i32, i32, i32
  }
  func.func @transform_1(%arg0: i32) -> (i32, i32, i32) {
    %c0_i32 = arith.constant 0 : i32
    %c0_i32_0 = arith.constant 0 : i32
    %c0_i32_1 = arith.constant 0 : i32
    return %c0_i32, %arg0, %c0_i32_0 : i32, i32, i32
  }
  func.func @transform_2(%arg0: i32) -> (i32, i32, i32) {
    %c0_i32 = arith.constant 0 : i32
    %c0_i32_0 = arith.constant 0 : i32
    %c0_i32_1 = arith.constant 0 : i32
    %c0_i32_2 = arith.constant 0 : i32
    return %c0_i32, %c0_i32_0, %c0_i32_1 : i32, i32, i32
  }
  func.func @transform_3(%arg0: i32) -> (i32, i32, i32) {
    %c0_i32 = arith.constant 0 : i32
    %c0_i32_0 = arith.constant 0 : i32
    %c0_i32_1 = arith.constant 0 : i32
    return %c0_i32, %arg0, %c0_i32_0 : i32, i32, i32
  }
  func.func @transform_4(%arg0: i32) -> (i32, i32, i32) {
    %c0_i32 = arith.constant 0 : i32
    %c0_i32_0 = arith.constant 0 : i32
    %c0_i32_1 = arith.constant 0 : i32
    return %c0_i32, %arg0, %c0_i32_0 : i32, i32, i32
  }
  func.func @transform_5(%arg0: i32) -> (i32, i32, i32) {
    %c0_i32 = arith.constant 0 : i32
    %c0_i32_0 = arith.constant 0 : i32
    %c0_i32_1 = arith.constant 0 : i32
    return %c0_i32, %arg0, %c0_i32_0 : i32, i32, i32
  }
}

</mosaic_0001>

<bundles_post_ra>
// kernel: tpu_custom_call.1
= control target key start
LH: loop header
LB: loop body
LE: loop exit
PB: predicated region body
PF: predicated region fallthrough
CT: control target
= control target key end

     0   :  { %s219_s0 = inlined_call_operand.<no memory space> [shape: f32[1,1,1], index: 0, kind: input, shape index: {}]   ;;  %s220_s1 = inlined_call_operand.vmem [shape: f32[2,4,128], index: 1, kind: input, shape index: {}]   ;;  %s221_s2 = inlined_call_operand.vmem [shape: f32[2,1,128], index: 2, kind: input, shape index: {}]   ;;  %s222_s3 = inlined_call_operand.vmem [shape: f32[1,4,1], index: 3, kind: input, shape index: {}]   ;;  %s223_s4 = inlined_call_operand.vmem [shape: f32[1,4,1], index: 4, kind: input, shape index: {}]   ;;  %s224_s5 = inlined_call_operand.hbm [shape: f32[2,4,128], index: 5, kind: output, shape index: {}]  }
   0x1   :  { %v10_v0 = vstv %s219_s0 }
   0x2   :  { %11 = vst [vmem:[#allocation2] sm:$0x1] %v10_v0 }
   0x3   :  { %v23_v1 = vld [vmem:[%s220_s1] sm:$0xf]  ;;  %v24_v2 = vld [vmem:[%s220_s1 + $0x4] sm:$0xf]  ;;  %vm42_vm0 = vcmask 1043456  }
   0x4   :  { %v113_v3 = vld [vmem:[%s221_s2] ss:$0 sm:$0xff]  ;;  %v114_v4 = vld [vmem:[%s221_s2 + $0x1] ss:$0 sm:$0xff] }
   0x5   :  { %v40_v5 = vmul.f32 %v113_v3, %v23_v1  ;;  %v41_v6 = vmul.f32 %v114_v4, %v24_v2 }
   0x6   :  { %12 = vsyncpa [#allocation4], 0  ;;  %v148_v10 = vmov 0   ;;  %v76_v29 = vld [vmem:[%s222_s3] sm:$0xf]  ;;  %s149_s29 = smov [#allocation3]  }
   0x7   :  { %v43_v7 = vsel %vm42_vm0, %v40_v5, 0.0  ;;  %v44_v8 = vsel %vm42_vm0, %v41_v6, 0.0  ;;  %120 = vset.pattern.permute.xlu0 %v148_v10  ;;  %121 = vset.pattern.permute.xlu1 %v148_v10  ;;  %v77_v32 = vld [vmem:[%s223_s4] sm:$0xf]  ;;  %s102_s30 = sshll.u32 %s149_s29, 4  ;;  %s103_s30 = int_to_ptr.vmem [resolvable:$true] %s102_s30 }
   0x8   :  { %v45_v9 = vadd.f32 %v44_v8, %v43_v7  ;;  %s124_s3 = scalar_lea.vmem %s103_s30, 128  ;;  %p129_p1 = scmp.lt.s32.totalorder %s103_s30, %s103_s30 }
   0x9   :  { %v115_v11 = vld [vmem:[#allocation2] ss:$0 sm:$0xff]  ;;  %p125_p0 = scmp.ne.s32.totalorder %s103_s30, %s124_s3  ;;  %p130_p2 = scmp.lt.s32.totalorder %s124_s3, %s124_s3 }
   0xa   :  { %46 = vadd.xlane.f32.xlu0 %v45_v9 }
   0xb   :  { %p131_p3 = por %p130_p2, %p129_p1 }
   0xd   :  { %p132_p4 = pnand %p131_p3, %p125_p0 }
  0x97   :  { %v47_v12 = vpop.xlane.xlu0 %46 }
  0x98   :  { %v54_v13 = vmul.f32 %v115_v11, %v47_v12 }
  0x9a   :  { %57 = vperm.xlu0 %120, %v54_v13   ;;  %v69_v22 = vmul.f32 224.0, %v54_v13 }
  0x9c   :  { %v70_v23 = vmul.f32 %v69_v22, %v54_v13 }
 0x119   :  { %v58_v14 = vpop.permute.xlu0 %57 }
 0x11a   :  { %v60_v15 = vsub.f32 %v40_v5, %v58_v14  ;;  %v61_v16 = vsub.f32 %v41_v6, %v58_v14 }
 0x11c   :  { %v62_v17 = vmul.f32 %v60_v15, %v60_v15  ;;  %v63_v18 = vmul.f32 %v61_v16, %v61_v16 }
 0x11e   :  { %v64_v19 = vsel %vm42_vm0, %v62_v17, 0.0  ;;  %v65_v20 = vsel %vm42_vm0, %v63_v18, 0.0 }
 0x11f   :  { %v66_v21 = vadd.f32 %v65_v20, %v64_v19 }
 0x121   :  { %67 = vadd.xlane.f32.xlu1 %v66_v21 }
 0x1ae   :  { %v68_v24 = vpop.xlane.xlu1 %67 }
 0x1af   :  { %v71_v25 = vsub.f32 %v68_v24, %v70_v23 }
 0x1b1   :  { %v72_v26 = vmul.f32 %v115_v11, %v71_v25 }
 0x1b3   :  { %v73_v27 = vmax.f32 %v72_v26, 0.0 }
 0x1b5   :  { %v74_v28 = vadd.f32 1e-05, %v73_v27 }
 0x1b7   :  { %122 = vrsqrt.f32 %v74_v28 }
 0x1c1   :  { %v123_v30 = vpop.eup %122 }
 0x1c2   :  { %v78_v31 = vmul.f32 %v123_v30, %v76_v29 }
 0x1c4   :  { %83 = vperm.xlu1 %121, %v78_v31   ;;  %v79_v33 = vmul.f32 %v78_v31, %v54_v13 }
 0x1c6   :  { %v80_v34 = vsub.f32 %v77_v32, %v79_v33 }
 0x1c8   :  { %90 = vperm.xlu1 %121, %v80_v34  }
 0x243   :  { %v84_v35 = vpop.permute.xlu1 %83 }
 0x244   :  { %v86_v36 = vmul.f32 %v84_v35, %v40_v5  ;;  %v87_v37 = vmul.f32 %v84_v35, %v41_v6 }
 0x247   :  { %v91_v38 = vpop.permute.xlu1 %90 }
 0x248   :  { %v93_v39 = vadd.f32 %v91_v38, %v86_v36  ;;  %v94_v40 = vadd.f32 %v91_v38, %v87_v37 }
 0x24a   :  { %95 = vst [vmem:[#allocation3] sm:$0xf] %v93_v39  ;;  %96 = vst [vmem:[#allocation3 + $0x4] sm:$0xf] %v94_v40 }
 0x24b   :  { %135 = shalt.err (!%p132_p4)
}
 0x24c   :  { %s136_s7 = scalar_lea.hbm %s224_s5, 128 }
 0x24d   :  { %p137_p5 = scmp.ne.s32.totalorder %s224_s5, %s136_s7  ;;  %p140_p6 = scmp.lt.u32.totalorder %s136_s7, %s224_s5 }
 0x24f   :  { %p142_p7 = pnand %p140_p6, %p137_p5 }
 0x251   :  { %145 = shalt.err (!%p142_p7)
}
 0x252   :  { %s150_s12 = smov 64   ;;  %s151_s13 = smov 4  }
 0x253   :  { %108 = dma.vmem_to_hbm [thread:$0]  %s103_s30, 128, %s224_s5, [#allocation4], %s150_s12, %s150_s12, %s151_s13  }
 0x254   :  { %146 = dma.done.wait [#allocation4], 128  }
 0x255   :  { %147 = vsyncadd [#allocation4], 4294967168 }
 0x256   :  { %112 = vsyncpa [#allocation4], 1 }

</bundles_post_ra>
